<compile_context>
chip_gen: v5e
topology: v5e:2x2
jax: 0.10.0
libtpu: 0.0.40
codegen_flags: <defaults>
</compile_context>

<pallas_src>
import functools

import jax
import jax.numpy as jnp
from jax import lax
from jax.experimental import pallas as pl
from jax.experimental.pallas import tpu as pltpu


def _round_up(n, m):
    return (n + m - 1) // m * m


def _vq_kernel(x_ref, e_mm_ref, e_t_ref, esq_ref, q_ref, loss_ref, *, hw):
    """Quantize one (C, TM) tile of channel-planar pixels.

    x_ref    : (C, TM)  streamed dtype  pixels (channels on sublanes, lane-dense)
    e_mm_ref : (K, C)   mm dtype        codebook, distance-matmul operand
    e_t_ref  : (C, K)   f32             pre-transposed codebook (exact codewords)
    esq_ref  : (K, 1)   f32             0.5 * ||e_k||^2
    q_ref    : (C, TM)  streamed dtype  quantized output (straight back in NCHW)
    loss_ref : (1, 1)   f32             per-block sum of squared error
    """
    x_in = x_ref[...]
    c, tm = x_in.shape
    k = e_mm_ref.shape[0]

    # Distance matmul on the MXU in the streamed precision, f32 accumulation:
    #   ex[k, m] = <e_k, x_m>
    x_mm = x_in.astype(e_mm_ref.dtype)
    ex = jnp.dot(e_mm_ref[...], x_mm, preferred_element_type=jnp.float32)    # (K, TM)

    # d/2 = 0.5*||e_k||^2 - <e_k, x_m>   (||x||^2 and the factor 2 dropped;
    # argmin is unchanged).
    d = esq_ref[...] - ex                                                    # (K, TM) f32

    # argmin over the codebook (sublane) axis, lowest-index tie-break
    # (matches torch.argmin), built from min + iota so it lowers cleanly and
    # stays in f32/int32 (v5e has no bf16 VALU).
    dmin = jnp.min(d, axis=0, keepdims=True)                                 # (1, TM)
    kio = lax.broadcasted_iota(jnp.int32, (k, tm), 0)                        # (K, TM)
    idx = jnp.min(jnp.where(d <= dmin, kio, k), axis=0, keepdims=True)       # (1, TM)
    onehot = (kio == idx).astype(jnp.float32)                                # (K, TM)

    # Gather codewords with the resident pre-transposed f32 codebook (no
    # per-step XLU transpose): q[c, m] = sum_k e_T[c, k] * onehot[k, m]
    q = jnp.dot(e_t_ref[...], onehot, preferred_element_type=jnp.float32)    # (C, TM)
    q_ref[...] = q.astype(q_ref.dtype)

    # Per-block SSE, masking lanes that are H*W padding.
    x32 = x_in.astype(jnp.float32)
    diff = q - x32
    lane = lax.broadcasted_iota(jnp.int32, (1, tm), 1)
    valid = (pl.program_id(1) * tm + lane) < hw                              # (1, TM)
    sq = jnp.where(valid, diff * diff, 0.0)
    loss_ref[...] = jnp.sum(sq, axis=(0, 1), keepdims=True)                  # (1, 1)


def permute_to_from_vq(x_nchw, codebook, *, tile_m=None):
    """Forward of PermuteToFrom(VectorQuantize).  Returns (out_nchw, loss)."""
    B, C, H, W = x_nchw.shape
    K, Ce = codebook.shape
    assert Ce == C
    HW = H * W

    in_dtype = x_nchw.dtype
    # Distance-matmul precision follows the streamed precision: bf16 operands
    # (native MXU rate) when the data is already low precision, exact f32
    # otherwise.  Accumulation is always f32.
    mm_dtype = jnp.float32 if in_dtype == jnp.float32 else jnp.bfloat16
    in_bytes = jnp.dtype(in_dtype).itemsize
    mm_bytes = jnp.dtype(mm_dtype).itemsize

    # ----- generation-aware VMEM budget -> tile size -------------------------
    try:
        vmem_cap = int(pltpu.get_tpu_info().vmem_capacity_bytes)
    except Exception:
        vmem_cap = 64 << 20                  # conservative fallback (v7x per-core)
    budget = (vmem_cap * 3) // 4             # ~48 MiB on v7x, ~96 MiB on v5e/v6e

    Kp, Cp = _round_up(K, 8), _round_up(C, 8)
    resident = 2 * (Kp * _round_up(C, 128) * mm_bytes      # e_mm
                    + Cp * _round_up(K, 128) * 4           # e_T (f32)
                    + Kp * 128 * 4)                        # 0.5*||e||^2
    per_px = (2 * Cp * in_bytes                            # x tile, double-buffered
              + 2 * Cp * in_bytes                          # q tile, double-buffered
              + 2 * Cp * 4                                 # f32 x / q inside the body
              + 4 * Kp * 4)                                # (K, TM) f32 intermediates
    slack = 2 << 20

    if tile_m is None:
        cap = (budget - resident - slack) // per_px
        tile_m = int(max(128, min(cap, 8192)))
    tile_m = max(128, (int(tile_m) // 128) * 128)
    if HW <= tile_m:
        tile_m = max(128, _round_up(HW, 128))
    # Keep >= 2 grid steps when B == 1 so both v7x TensorCores get work.
    if B == 1 and tile_m > 128 and pl.cdiv(HW, tile_m) < 2:
        tile_m = max(128, _round_up(pl.cdiv(HW, 2), 128))
    num_tiles = pl.cdiv(HW, tile_m)
    HW_pad = num_tiles * tile_m

    need = resident + per_px * tile_m + slack
    vmem_limit = int(min(max(need, 16 << 20), max(budget, 16 << 20)))

    # ----- glue: NCHW -> (B, C, H*W).  Native dtype, no permute, no cast. -----
    x_rows = x_nchw.reshape(B, C, HW)
    if HW_pad != HW:
        x_rows = jnp.pad(x_rows, ((0, 0), (0, 0), (0, HW_pad - HW)))

    cb32 = codebook.astype(jnp.float32)
    e_mm = cb32.astype(mm_dtype)                                      # (K, C)
    e_t = cb32.T                                                      # (C, K) exact codewords
    esq_half = 0.5 * jnp.sum(cb32 * cb32, axis=-1, keepdims=True)     # (K, 1)

    q_rows, loss_parts = pl.pallas_call(
        functools.partial(_vq_kernel, hw=HW),
        out_shape=(
            jax.ShapeDtypeStruct((B, C, HW_pad), in_dtype),
            jax.ShapeDtypeStruct((B, num_tiles, 1, 1), jnp.float32),
        ),
        grid_spec=pltpu.PrefetchScalarGridSpec(
            num_scalar_prefetch=0,
            grid=(B, num_tiles),
            in_specs=[
                # x tile: channels on sublanes, pixels lane-dense.
                # (If a profile shows exposed DMA, add pipeline_mode=pl.Buffered(3).)
                pl.BlockSpec((None, C, tile_m), lambda b, i: (b, 0, i)),
                pl.BlockSpec((K, C), lambda b, i: (0, 0)),             # e_mm (resident)
                pl.BlockSpec((C, K), lambda b, i: (0, 0)),             # e_T  (resident)
                pl.BlockSpec((K, 1), lambda b, i: (0, 0)),             # 0.5*||e||^2
            ],
            out_specs=[
                pl.BlockSpec((None, C, tile_m), lambda b, i: (b, 0, i)),      # q
                pl.BlockSpec((None, None, 1, 1), lambda b, i: (b, i, 0, 0)),  # SSE
            ],
        ),
        compiler_params=pltpu.CompilerParams(
            dimension_semantics=("parallel", "parallel"),
            vmem_limit_bytes=vmem_limit,
        ),
    )(x_rows, e_mm, e_t, esq_half)

    # ----- glue: (B, C, H*W) -> NCHW.  Slice off padding, pure reshape. -------
    if HW_pad != HW:
        q_rows = q_rows[..., :HW]
    out_nchw = q_rows.reshape(B, C, H, W)
    loss = jnp.sum(loss_parts) / jnp.float32(B * C * HW)
    return out_nchw, loss


def _reference(x_nchw, codebook):
    """Pure-JAX reference of the same forward pass (permute -> VQ -> permute)."""
    B, C, H, W = x_nchw.shape
    x = jnp.transpose(x_nchw, (0, 2, 3, 1)).reshape(-1, C).astype(jnp.float32)
    cb = codebook.astype(jnp.float32)
    d = jnp.sum(cb ** 2, axis=-1)[None, :] - 2.0 * x @ cb.T
    idx = jnp.argmin(d, axis=-1)
    q = cb[idx]
    loss = jnp.mean((q - x) ** 2)
    out = jnp.transpose(q.reshape(B, H, W, C), (0, 3, 1, 2))
    return out, loss


if __name__ == "__main__":
    key = jax.random.PRNGKey(0)
    kx, ke, kr = jax.random.split(key, 3)

    B, C, H, W = 2, 4, 16, 16          # NCHW input, as the PyTorch module expects
    K = 16                             # codebook size (fq_dict_size)

    x = jax.random.normal(kx, (B, C, H, W), dtype=jnp.float32)
    codebook = jax.random.normal(ke, (K, C), dtype=jnp.float32)

    # --- f32 path: exact against the pure-JAX reference ----------------------
    out, loss = permute_to_from_vq(x, codebook)
    jax.block_until_ready((out, loss))
    ref_out, ref_loss = _reference(x, codebook)
    assert out.shape == (B, C, H, W) and out.dtype == x.dtype
    assert jnp.allclose(out, ref_out, atol=1e-5), "output mismatch (f32)"
    assert jnp.allclose(loss, ref_loss, atol=1e-5), "loss mismatch (f32)"

    # --- ragged H*W path: exercises padding + masked SSE ---------------------
    x_r = jax.random.normal(kr, (1, C, 5, 7), dtype=jnp.float32)
    out_r, loss_r = permute_to_from_vq(x_r, codebook)
    jax.block_until_ready((out_r, loss_r))
    ref_out_r, ref_loss_r = _reference(x_r, codebook)
    assert jnp.allclose(out_r, ref_out_r, atol=1e-5), "output mismatch (ragged)"
    assert jnp.allclose(loss_r, ref_loss_r, atol=1e-5), "loss mismatch (ragged)"

    # --- bf16 streaming path: native-dtype I/O + bf16 MXU distances ----------
    # (near-tie argmin flips vs the f32 reference are possible by design, so
    #  only shapes/dtype and the loss are sanity-checked here.)
    out_bf, loss_bf = permute_to_from_vq(x.astype(jnp.bfloat16), codebook)
    jax.block_until_ready((out_bf, loss_bf))
    assert out_bf.shape == (B, C, H, W) and out_bf.dtype == jnp.bfloat16
    assert jnp.allclose(loss_bf, ref_loss, rtol=0.05, atol=1e-3), "loss mismatch (bf16)"

    print("KERNEL_OK")
</pallas_src>

<mosaic_0001>
module attributes {stable_mosaic.version = 11 : i64} {
  func.func @_vq_kernel(%arg0: i32, %arg1: i32, %arg2: memref<1x4x256xf32, #tpu.memory_space<vmem>>, %arg3: memref<16x4xf32, #tpu.memory_space<vmem>>, %arg4: memref<4x16xf32, #tpu.memory_space<vmem>>, %arg5: memref<16x1xf32, #tpu.memory_space<vmem>>, %arg6: memref<1x4x256xf32, #tpu.memory_space<vmem>>, %arg7: memref<1x1x1x1xf32, #tpu.memory_space<vmem>>) attributes {dimension_semantics = [#tpu.dimension_semantics<parallel>, #tpu.dimension_semantics<parallel>], iteration_bounds = array<i64: 2, 1>, scalar_prefetch = 0 : i64, scratch_operands = 0 : i64, tpu.core_type = #tpu.core_type<tc>, window_params = [{transform_indices = @transform_0, window_bounds = array<i64: 1, 4, 256>}, {pipeline_mode = #tpu.pipeline_mode<synchronous>, transform_indices = @transform_1, window_bounds = array<i64: 16, 4>}, {pipeline_mode = #tpu.pipeline_mode<synchronous>, transform_indices = @transform_2, window_bounds = array<i64: 4, 16>}, {pipeline_mode = #tpu.pipeline_mode<synchronous>, transform_indices = @transform_3, window_bounds = array<i64: 16, 1>}, {transform_indices = @transform_4, window_bounds = array<i64: 1, 4, 256>}, {transform_indices = @transform_5, window_bounds = array<i64: 1, 1, 1, 1>}]} {
    %c0 = arith.constant 0 : index
    %c0_0 = arith.constant 0 : index
    %c0_1 = arith.constant 0 : index
    %0 = vector.load %arg2[%c0, %c0_0, %c0_1] : memref<1x4x256xf32, #tpu.memory_space<vmem>>, vector<1x4x256xf32>
    %1 = vector.shape_cast %0 : vector<1x4x256xf32> to vector<4x256xf32>
    %c0_2 = arith.constant 0 : index
    %c0_3 = arith.constant 0 : index
    %2 = vector.load %arg3[%c0_2, %c0_3] : memref<16x4xf32, #tpu.memory_space<vmem>>, vector<16x4xf32>
    %cst = arith.constant dense<0.000000e+00> : vector<16x256xf32>
    %3 = tpu.matmul %2, %1, %cst {dimension_numbers = #tpu.dot_dimension_numbers<[1], [0], [0], [1], [0, 0, 1, 1], [], []>} : vector<16x4xf32>, vector<4x256xf32>, vector<16x256xf32> -> vector<16x256xf32>
    %c0_4 = arith.constant 0 : index
    %c0_5 = arith.constant 0 : index
    %4 = vector.load %arg5[%c0_4, %c0_5] : memref<16x1xf32, #tpu.memory_space<vmem>>, vector<16x1xf32>
    %5 = vector.broadcast %4 : vector<16x1xf32> to vector<16x256xf32>
    %6 = arith.subf %5, %3 : vector<16x256xf32>
    %cst_6 = arith.constant dense<0x7F800000> : vector<256xf32>
    %7 = vector.multi_reduction <minimumf>, %6, %cst_6 [0] : vector<16x256xf32> to vector<256xf32>
    %8 = vector.shape_cast %7 : vector<256xf32> to vector<1x256xf32>
    %9 = tpu.iota {dimensions = array<i32: 0>} : vector<16x256xi32>
    %10 = vector.broadcast %8 : vector<1x256xf32> to vector<16x256xf32>
    %11 = arith.cmpf ole, %6, %10 : vector<16x256xf32>
    %c16_i32 = arith.constant 16 : i32
    %12 = vector.broadcast %c16_i32 : i32 to vector<16x256xi32>
    %13 = arith.select %11, %9, %12 : vector<16x256xi1>, vector<16x256xi32>
    %cst_7 = arith.constant dense<2147483647> : vector<256xi32>
    %14 = vector.multi_reduction <minsi>, %13, %cst_7 [0] : vector<16x256xi32> to vector<256xi32>
    %15 = vector.shape_cast %14 : vector<256xi32> to vector<1x256xi32>
    %16 = vector.broadcast %15 : vector<1x256xi32> to vector<16x256xi32>
    %17 = arith.cmpi eq, %9, %16 : vector<16x256xi32>
    %18 = arith.extui %17 : vector<16x256xi1> to vector<16x256xi32>
    %19 = arith.sitofp %18 : vector<16x256xi32> to vector<16x256xf32>
    %c0_8 = arith.constant 0 : index
    %c0_9 = arith.constant 0 : index
    %20 = vector.load %arg4[%c0_8, %c0_9] : memref<4x16xf32, #tpu.memory_space<vmem>>, vector<4x16xf32>
    %cst_10 = arith.constant dense<0.000000e+00> : vector<4x256xf32>
    %21 = tpu.matmul %20, %19, %cst_10 {dimension_numbers = #tpu.dot_dimension_numbers<[1], [0], [0], [1], [0, 0, 1, 1], [], []>} : vector<4x16xf32>, vector<16x256xf32>, vector<4x256xf32> -> vector<4x256xf32>
    %c0_11 = arith.constant 0 : index
    %c0_12 = arith.constant 0 : index
    %c0_13 = arith.constant 0 : index
    %22 = vector.load %arg6[%c0_11, %c0_12, %c0_13] : memref<1x4x256xf32, #tpu.memory_space<vmem>>, vector<1x4x256xf32>
    %23 = vector.shape_cast %22 : vector<1x4x256xf32> to vector<4x256xf32>
    %24 = vector.shape_cast %21 : vector<4x256xf32> to vector<1x4x256xf32>
    tpu.vector_store %arg6[%c0_11, %c0_12, %c0_13], %24 {strides = array<i32>} : memref<1x4x256xf32, #tpu.memory_space<vmem>>, vector<1x4x256xf32>,
    %25 = arith.subf %21, %1 : vector<4x256xf32>
    %26 = tpu.iota {dimensions = array<i32: 1>} : vector<1x256xi32>
    %c256_i32 = arith.constant 256 : i32
    %27 = arith.muli %arg1, %c256_i32 : i32
    %28 = vector.broadcast %27 : i32 to vector<1x256xi32>
    %29 = arith.addi %28, %26 : vector<1x256xi32>
    %c256_i32_14 = arith.constant 256 : i32
    %30 = vector.broadcast %c256_i32_14 : i32 to vector<1x256xi32>
    %31 = arith.cmpi slt, %29, %30 : vector<1x256xi32>
    %32 = arith.mulf %25, %25 : vector<4x256xf32>
    %cst_15 = arith.constant 0.000000e+00 : f32
    %33 = vector.shape_cast %31 : vector<1x256xi1> to vector<1x256xi1>
    %34 = vector.broadcast %33 : vector<1x256xi1> to vector<4x256xi1>
    %35 = vector.broadcast %cst_15 : f32 to vector<4x256xf32>
    %36 = arith.select %34, %32, %35 : vector<4x256xi1>, vector<4x256xf32>
    %37 = vector.shape_cast %36 : vector<4x256xf32> to vector<1x4x256xf32>
    %cst_16 = arith.constant dense<0.000000e+00> : vector<1xf32>
    %38 = vector.multi_reduction <add>, %37, %cst_16 [1, 2] : vector<1x4x256xf32> to vector<1xf32>
    %39 = vector.shape_cast %38 : vector<1xf32> to vector<1x1x1xf32>
    %40 = vector.extract %39[0, 0, 0] : f32 from vector<1x1x1xf32>
    %41 = vector.broadcast %40 : f32 to vector<1x1xf32>
    %c0_17 = arith.constant 0 : index
    %c0_18 = arith.constant 0 : index
    %c0_19 = arith.constant 0 : index
    %c0_20 = arith.constant 0 : index
    %42 = vector.load %arg7[%c0_17, %c0_18, %c0_19, %c0_20] : memref<1x1x1x1xf32, #tpu.memory_space<vmem>>, vector<1x1x1x1xf32>
    %43 = vector.shape_cast %42 : vector<1x1x1x1xf32> to vector<1x1xf32>
    %44 = vector.shape_cast %41 : vector<1x1xf32> to vector<1x1x1x1xf32>
    tpu.vector_store %arg7[%c0_17, %c0_18, %c0_19, %c0_20], %44 {strides = array<i32>} : memref<1x1x1x1xf32, #tpu.memory_space<vmem>>, vector<1x1x1x1xf32>,
    return
  }
  func.func @transform_0(%arg0: i32, %arg1: i32) -> (i32, i32, i32) {
    %c0_i32 = arith.constant 0 : i32
    %c0_i32_0 = arith.constant 0 : i32
    return %arg0, %c0_i32, %arg1 : i32, i32, i32
  }
  func.func @transform_1(%arg0: i32, %arg1: i32) -> (i32, i32) {
    %c0_i32 = arith.constant 0 : i32
    %c0_i32_0 = arith.constant 0 : i32
    %c0_i32_1 = arith.constant 0 : i32
    return %c0_i32, %c0_i32_0 : i32, i32
  }
  func.func @transform_2(%arg0: i32, %arg1: i32) -> (i32, i32) {
    %c0_i32 = arith.constant 0 : i32
    %c0_i32_0 = arith.constant 0 : i32
    %c0_i32_1 = arith.constant 0 : i32
    return %c0_i32, %c0_i32_0 : i32, i32
  }
  func.func @transform_3(%arg0: i32, %arg1: i32) -> (i32, i32) {
    %c0_i32 = arith.constant 0 : i32
    %c0_i32_0 = arith.constant 0 : i32
    %c0_i32_1 = arith.constant 0 : i32
    return %c0_i32, %c0_i32_0 : i32, i32
  }
  func.func @transform_4(%arg0: i32, %arg1: i32) -> (i32, i32, i32) {
    %c0_i32 = arith.constant 0 : i32
    %c0_i32_0 = arith.constant 0 : i32
    return %arg0, %c0_i32, %arg1 : i32, i32, i32
  }
  func.func @transform_5(%arg0: i32, %arg1: i32) -> (i32, i32, i32, i32) {
    %c0_i32 = arith.constant 0 : i32
    %c0_i32_0 = arith.constant 0 : i32
    %c0_i32_1 = arith.constant 0 : i32
    return %arg0, %arg1, %c0_i32, %c0_i32_0 : i32, i32, i32, i32
  }
}

</mosaic_0001>

<bundles_post_ra>
// kernel: tpu_custom_call.1
= control target key start
LH: loop header
LB: loop body
LE: loop exit
PB: predicated region body
PF: predicated region fallthrough
CT: control target
= control target key end

     0   :  { %s958_s0 = inlined_call_operand.vmem [shape: f32[2,4,256], index: 0, kind: input, shape index: {}]   ;;  %s959_s1 = inlined_call_operand.vmem [shape: f32[16,4], index: 1, kind: input, shape index: {}]   ;;  %s960_s2 = inlined_call_operand.vmem [shape: f32[4,16], index: 2, kind: input, shape index: {}]   ;;  %s961_s3 = inlined_call_operand.vmem [shape: f32[16,1], index: 3, kind: input, shape index: {}]   ;;  %s962_s4 = inlined_call_operand.hbm [shape: f32[2,4,256], index: 4, kind: output, shape index: {0}]   ;;  %s963_s5 = inlined_call_operand.vmem [shape: f32[2,1,1,1], index: 5, kind: output, shape index: {1}]  }
   0x1   :  { %964 = sst [smem:[#allocation5_spill]] %s958_s0 }
   0x2   :  { %11 = vsyncpa [#allocation3], 0 }
   0x3   :  { %13 = vsyncpa [#allocation3 + $0x1], 0  ;;  %s834_s18 = smov 0   ;;  %s836_s19 = smov 0  }
   0x4   :  { %s838_s20 = smov 0   ;;  %s840_s21 = smov 0  }
   0x5   :  { %s842_s22 = smov 0   ;;  %s844_s23 = smov 0  }
   0x6 LB: > { %s631_s24 = sadd.s32 4294967295, %s800_s23   ;;  %s632_s25 = sadd.s32 4294967294, %s800_s23   ;;  %s800_s23 = sphi %s844_s23, %s19_s23   ;;  %s796_s22 = sphi %s842_s22, %s972_s22   ;;  %s792_s21 = sphi %s840_s21, %s971_s21   ;;  %s788_s20 = sphi %s838_s20, %s970_s20   ;;  %s784_s19 = sphi %s836_s19, %s969_s19   ;;  %s780_s18 = sphi %s834_s18, %s968_s18  }
   0x7   : > { %s31_s26 = sadd.s32 1, %s796_s22  ;;  %s131_s27 = sadd.s32 1, %s788_s20 }
   0x8   : > { %p33_p0 = scmp.ge.s32.totalorder %s31_s26, 2  ;;  %p141_p1 = scmp.ne.s32.totalorder %s788_s20, %s784_s19 }
   0x9   : > { %p142_p2 = scmp.eq.s32.totalorder %s631_s24, 1  ;;  %p147_p3 = scmp.ne.s32.totalorder %s784_s19, %s780_s18 }
   0xa   : > { %s974_s26 = smov (%p33_p0, %s31_s26), 0  ;;  %p148_p5 = scmp.eq.s32.totalorder %s632_s25, 1 }
   0xb   : > { %p874_p4 = por %p142_p2, %p141_p1  ;;  %s126_s29 = ssub.s32 %s796_s22, %s974_s26 }
   0xc   : > { %p635_p6 = scmp.ge.s32.totalorder %s800_s23, 1  ;;  %p129_p7 = scmp.eq.s32.totalorder %s126_s29, 0 }
   0xd   : > { %p881_p8 = por %p148_p5, %p147_p3  ;;  %p216_p9 = scmp.lt.s32.totalorder %s800_s23, 3 }
   0xe   : > { %s887_s6 = scalar_select %p129_p7, %s788_s20, %s131_s27  }
   0xf   : > { %p217_p10 = pnand %p635_p6, %p216_p9 }
  0x10   : > { %p255_p11 = scmp.lt.s32.totalorder (!%p217_p10), %s792_s21, 1  ;;  %s967_s0 = sld [smem:[#allocation5_spill]] (!%p217_p10) }
  0x11   : > { %220 = sbr.rel (%p217_p10) target bundleno = 525 (0x20d), region = 36  ;;  %s243_s7 = sand.u32 (!%p217_p10), 1, %s784_s19  }
  0x12   : > { %s636_s8 = sshll.u32 (!%p217_p10), %s243_s7, 3  ;;  %s661_s11 = sshll.u32 (!%p217_p10), %s792_s21, 3 }
  0x13   : > { %s521_s14 = scalar_lea.hbm (!%p217_p10), %s962_s4, %s661_s11  ;;  %s502_s17 = scalar_lea.sflag (!%p217_p10), [#allocation3], %s243_s7 }
  0x14   : > { %s525_s16 = sshll.u32 (!%p217_p10), %s521_s14, 4  ;;  %s526_s16 = int_to_ptr.hbm [resolvable:$true] %s525_s16 }
  0x15   : > { %s736_s24 = sshra.s32 (!%p217_p10), %s526_s16, 4  ;;  %s737_s24 = int_to_ptr.hbm [resolvable:$true] %s736_s24 }
  0x16   : > { %v336_v0 = vld [vmem:[%s961_s3] sm:$0xff]  ;;  %v802_v1 = vmov 0   ;;  %s894_s9 = scalar_select %p255_p11, %s792_s21, 1  ;;  %v337_v3 = vld [vmem:[%s961_s3 + $0x8] sm:$0xff]  ;;  %vm285_vm0 = vcmask 1043456   ;;  %vm278_vm1 = vcmask 31744   ;;  %v366_v22 = vlaneseq }
  0x17   : > { %721 = vset.pattern.permute.xlu0 %v802_v1  ;;  %v272_v4 = vld [vmem:[%s959_s1] sm:$0xff]  ;;  %v273_v7 = vld [vmem:[%s959_s1 + $0x8] sm:$0xff]  ;;  %v803_v53 = vmov 1.0   ;;  %s738_s25 = scalar_lea.hbm %s737_s24, 8  ;;  %s742_s21 = scalar_lea.hbm %s962_s4, 16 }
  0x18   : > { %340 = vperm.xlu0 %721, %v336_v0   ;;  %s660_s10 = sshll.u32 %s894_s9, 3  ;;  %v367_v27 = vshrl.u32 %v366_v22, 7  ;;  %v411_v54 = vld [vmem:[%s960_s2] sm:$0xf]  ;;  %p739_p12 = scmp.ne.s32.totalorder %s737_s24, %s738_s25 }
  0x19   : > { %s262_s13 = scalar_lea.vmem %s967_s0, %s660_s10  ;;  %s245_s10 = scalar_lea.vmem [#allocation2], %s636_s8 }
  0x1a   : > { %v271_v2 = vld [vmem:[%s262_s13] sm:$0xff]  ;;  %v368_v32 = vadd.s32 8, %v367_v27  ;;  %s523_s15 = sshll.u32 %s245_s10, 4  ;;  %p740_p13 = pnand %p739_p12, %p874_p4  ;;  %s524_s15 = int_to_ptr.vmem [resolvable:$true] %s523_s15 }
  0x1b   : > { %275 = vst [vmem:[#allocation1] ss:$2 sm:$0xff] %v271_v2  ;;  %p743_p1 = scmp.lt.s32.totalorder %s737_s24, %s962_s4  ;;  %p744_p2 = scmp.lt.s32.totalorder %s742_s21, %s738_s25 }
  0x1c   : > { %p741_p0 = pneg %p740_p13 }
  0x1d   : > { %p745_p3 = por %p744_p2, %p743_p1 }
  0x1f   : > { %p746_p5 = pnand %p745_p3, %p741_p0 }
  0x20   : > { %345 = vperm.xlu0 %721, %v337_v3  }
  0x22   : > { %v276_v5 = vld.sshfl [vmem:[#allocation1] sm:$0xff pattern:$0x75316420]  ;;  %v277_v6 = vld.sshfl [vmem:[#allocation1 + $0x8] sm:$0xff pattern:$0x75316420] }
  0x23   : > { %639 = vmatpush.msk.msra.mxu0 %vm285_vm0, %v276_v5  ;;  %642 = vmatpush.msk.msra.mxu1 %vm285_vm0, %v277_v6  ;;  %462 = vst [vmem:[#allocation1] ss:$2 sm:$0xff] %v271_v2 }
  0x24   : > { %640 = vmatmul.msk.f32.vlgmr.msra.gmra.mxu0 %vm278_vm1, %v272_v4  ;;  %643 = vmatmul.msk.f32.vlgmr.msra.gmra.mxu1 %vm278_vm1, %v272_v4 }
  0x2a   : > { %v463_v55 = vld.sshfl [vmem:[#allocation1] sm:$0xff pattern:$0x75316420]  ;;  %v464_v56 = vld.sshfl [vmem:[#allocation1 + $0x8] sm:$0xff pattern:$0x75316420] }
  0x2c   : > { %641 = vmatmul.msk.f32.gmra.mxu0 %vm278_vm1, %v273_v7  ;;  %644 = vmatmul.msk.f32.gmra.mxu1 %vm278_vm1, %v273_v7  ;;  %vm412_vm1 = vcmask 130048  }
  0x8a   : > { %v341_v8 = vpop.permute.xlu0 %340 }
  0x92   : > { %v346_v11 = vpop.permute.xlu0 %345 }
  0xa1   : > { %v307_v9 = vpop.f32.mrf.mxu0  ;;  %v330_v10 = vpop.f32.mrf.mxu1 }
  0xa2   : > { %v348_v14 = vsub.f32 %v341_v8, %v307_v9  ;;  %v349_v15 = vsub.f32 %v341_v8, %v330_v10 }
  0xa9   : > { %v310_v12 = vpop.f32.mrf.mxu0  ;;  %v333_v13 = vpop.f32.mrf.mxu1 }
  0xaa   : > { %v350_v16 = vsub.f32 %v346_v11, %v310_v12  ;;  %v351_v17 = vsub.f32 %v346_v11, %v333_v13 }
  0xac   : > { %v352_v18 = vmin.f32 %v348_v14, %v350_v16  ;;  %v359_v19 = vmin.f32 %v349_v15, %v351_v17 }
  0xae   : > { %v353_v20 = vrot.slane %v352_v18, 4  ;;  %v360_v21 = vrot.slane %v359_v19, 4 }
  0xb0   : > { %v354_v23 = vmin.f32 %v352_v18, %v353_v20  ;;  %v361_v24 = vmin.f32 %v359_v19, %v360_v21 }
  0xb2   : > { %v355_v25 = vrot.slane %v354_v23, 2  ;;  %v362_v26 = vrot.slane %v361_v24, 2 }
  0xb4   : > { %v356_v28 = vmin.f32 %v354_v23, %v355_v25  ;;  %v363_v29 = vmin.f32 %v361_v24, %v362_v26 }
  0xb6   : > { %v357_v30 = vrot.slane %v356_v28, 1  ;;  %v364_v31 = vrot.slane %v363_v29, 1 }
  0xb8   : > { %v358_v33 = vmin.f32 %v356_v28, %v357_v30  ;;  %v365_v34 = vmin.f32 %v363_v29, %v364_v31 }
  0xba   : > { %vm369_vm2 = vcmp.le.f32.partialorder %v348_v14, %v358_v33  ;;  %vm371_vm3 = vcmp.le.f32.partialorder %v350_v16, %v358_v33  ;;  %vm370_vm4 = vcmp.le.f32.partialorder %v349_v15, %v365_v34  ;;  %vm372_vm5 = vcmp.le.f32.partialorder %v351_v17, %v365_v34 }
  0xbb   : > { %v373_v35 = vsel %vm369_vm2, %v367_v27, 16  ;;  %v375_v36 = vsel %vm371_vm3, %v368_v32, 16  ;;  %v374_v37 = vsel %vm370_vm4, %v367_v27, 16  ;;  %v376_v38 = vsel %vm372_vm5, %v368_v32, 16 }
  0xbc   : > { %vm377_vm6 = vcmp.lt.s32.totalorder %v373_v35, %v375_v36  ;;  %vm388_vm7 = vcmp.lt.s32.totalorder %v374_v37, %v376_v38 }
  0xbd   : > { %v378_v39 = vsel %vm377_vm6, %v373_v35, %v375_v36  ;;  %v389_v40 = vsel %vm388_vm7, %v374_v37, %v376_v38 }
  0xbe   : > { %v379_v41 = vrot.slane %v378_v39, 4  ;;  %v390_v42 = vrot.slane %v389_v40, 4 }
  0xc0   : > { %vm380_vm8 = vcmp.lt.s32.totalorder %v378_v39, %v379_v41  ;;  %vm391_vm9 = vcmp.lt.s32.totalorder %v389_v40, %v390_v42 }
  0xc1   : > { %v381_v43 = vsel %vm380_vm8, %v378_v39, %v379_v41  ;;  %v392_v44 = vsel %vm391_vm9, %v389_v40, %v390_v42 }
  0xc2   : > { %v382_v45 = vrot.slane %v381_v43, 2  ;;  %v393_v46 = vrot.slane %v392_v44, 2 }
  0xc4   : > { %vm383_vm10 = vcmp.lt.s32.totalorder %v381_v43, %v382_v45  ;;  %vm394_vm11 = vcmp.lt.s32.totalorder %v392_v44, %v393_v46 }
  0xc5   : > { %v384_v47 = vsel %vm383_vm10, %v381_v43, %v382_v45  ;;  %v395_v48 = vsel %vm394_vm11, %v392_v44, %v393_v46 }
  0xc6   : > { %v385_v49 = vrot.slane %v384_v47, 1  ;;  %v396_v50 = vrot.slane %v395_v48, 1 }
  0xc8   : > { %vm386_vm12 = vcmp.lt.s32.totalorder %v384_v47, %v385_v49  ;;  %vm397_vm13 = vcmp.lt.s32.totalorder %v395_v48, %v396_v50 }
  0xc9   : > { %v387_v51 = vsel %vm386_vm12, %v384_v47, %v385_v49  ;;  %v398_v52 = vsel %vm397_vm13, %v395_v48, %v396_v50 }
  0xca   : > { %vm401_vm14 = vcmp.eq.s32.totalorder %v368_v32, %v387_v51  ;;  %vm402_vm15 = vcmp.eq.s32.totalorder %v368_v32, %v398_v52  ;;  %vm399_vm2 = vcmp.eq.s32.totalorder %v367_v27, %v387_v51  ;;  %vm400_vm3 = vcmp.eq.s32.totalorder %v367_v27, %v398_v52 }
  0xcb   : > { %649 = vmatpush.msk.msra.mxu2 %vm401_vm14, %v803_v53  ;;  %652 = vmatpush.msk.msra.mxu3 %vm402_vm15, %v803_v53 }
  0xcd   : > { %650 = vmatpush.msk.msra.mxu2 %vm399_vm2, %v803_v53  ;;  %653 = vmatpush.msk.msra.mxu3 %vm400_vm3, %v803_v53 }
  0xce   : > { %651 = vmatmul.msk.f32.vlgmr.msra.gmra.mxu2 %vm412_vm1, %v411_v54  ;;  %654 = vmatmul.msk.f32.vlgmr.msra.gmra.mxu3 %vm412_vm1, %v411_v54 }
 0x151   : > { %v433_v57 = vpop.f32.mrf.mxu2  ;;  %v453_v58 = vpop.f32.mrf.mxu3 }
 0x152   : > { %v467_v59 = vsub.f32 %v433_v57, %v463_v55  ;;  %v458_v60 = vrot.slane %v453_v58, 4  ;;  %v468_v61 = vsub.f32 %v453_v58, %v464_v56 }
 0x154   : > { %v478_v62 = vmul.f32 %v467_v59, %v467_v59  ;;  %v479_v63 = vmul.f32 %v468_v61, %v468_v61  ;;  %v459_v0 = vsel %vm285_vm0, %v433_v57, %v458_v60 }
 0x155   : > { %461 = vst [vmem:[%s245_s10] sm:$0xff] %v459_v0 }
 0x156   : > { %v486_v1 = vsel %vm285_vm0, %v478_v62, 0.0  ;;  %v487_v2 = vsel %vm285_vm0, %v479_v63, 0.0 }
 0x157   : > { %v488_v3 = vadd.f32 %v487_v2, %v486_v1 }
 0x159   : > { %489 = vadd.xlane.f32.xlu1 %v488_v3 }
 0x15a   : > { %749 = shalt.err (!%p746_p5)
}
 0x15b   : > { %664 = dma.vmem_to_hbm [thread:$0]  (%p874_p4), %s524_s15, 128, %s526_s16, %s502_s17   ;;  %vm499_vm0 = vcmask 0  }
 0x15c   : > { %s270_s0 = scalar_lea.vmem %s963_s5, %s894_s9 }
 0x1cc   : > { %v490_v4 = vpop.xlane.xlu1 %489 }
 0x1cd   : > { %v491_v5 = vrot.slane %v490_v4, 4 }
 0x1cf   : > { %v492_v6 = vadd.f32 %v491_v5, %v490_v4 }
 0x1d1   : > { %v493_v7 = vrot.slane %v492_v6, 2 }
 0x1d3   : > { %v494_v8 = vadd.f32 %v493_v7, %v492_v6 }
 0x1d5   : > { %v495_v9 = vrot.slane %v494_v8, 1 }
 0x1d7   : > { %v496_v10 = vadd.f32 %v495_v9, %v494_v8 }
 0x1d9   : > { %662 = vpush %v496_v10 }
 0x20a   : > { %s663_s11 = spop %662 }
 0x20b   : > { %v498_v11 = vstv %s663_s11 }
 0x20c   : > { %500 = vst.msk [vmem:[%s270_s0] sm:$0x1] %vm499_vm0, %v498_v11 }
 0x20d PF: > { %p670_p4 = scmp.ge.s32.totalorder %s800_s23, 2  ;;  %s540_s28 = sand.u32 1, %s780_s18  }
 0x20e   : > { %s541_s12 = scalar_lea.sflag [#allocation3], %s540_s28 }
 0x20f   : > { %p667_p6 = pnand %p670_p4, %p881_p8 }
 0x211   : > { %p668_p7 = pneg %p667_p6 }
 0x213   : > { %775 = dma.done.wait (%p668_p7), %s541_s12, 128  }
 0x214   : > { %777 = vsyncadd (%p668_p7), %s541_s12, 4294967168  ;;  %s19_s23 = sadd.s32 1, %s800_s23   ;;  %s968_s18 = smov %s784_s19 }
 0x215   : > { %p16_p9 = scmp.ge.s32.totalorder %s19_s23, 4   ;;  %s969_s19 = smov %s788_s20 }
 0x216   : > { %s970_s20 = smov %s887_s6  ;;  %s971_s21 = smov %s796_s22 }
 0x217   : > { %s972_s22 = smov %s974_s26  ;;  %18 = sbr.rel (!%p16_p9) target bundleno = 6 (0x6), region = 83 }
 0x21c   :  { %556 = vsyncpa [#allocation3], 1 }
 0x21d   :  { %558 = vsyncpa [#allocation3 + $0x1], 1 }

</bundles_post_ra>
